<compile_context>
chip_gen: v6e
topology: v6e:2x2x1
jax: 0.10.0
libtpu: 0.0.40
codegen_flags: <defaults>
</compile_context>

<pallas_src>
import math
from functools import partial

import jax
import jax.numpy as jnp
from jax.experimental import pallas as pl
from jax.experimental.pallas import tpu as pltpu


def _round_up(x, m):
    return (x + m - 1) // m * m


# ---------------------------------------------------------------------------
# TimeDelay (x -> pad -> unfold -> linear) as a tiled Pallas TPU kernel.
# out[n, o, l] = b[o] + sum_{c,k} W[o, c*K+k] * x_pad[n, c, l*stride + k*dil]
# ---------------------------------------------------------------------------
def _timedelay_kernel(*refs, K, dilation, C_in_pad, L_TILE, has_bias):
    # K == 1 : x_ref (1, C_in_pad, L_TILE)
    # K >  1 : x_ref (1, 1, C_in_pad, L_TILE + dilation*(K-1))  (overlapping window)
    # w_ref  : (CO_TILE, K*C_in_pad)   layout [o, k*C_in_pad + c]
    # b_ref  : (CO_TILE, 1) f32        (only when has_bias)
    # o_ref  : (1, CO_TILE, L_TILE)    lane-dense output tile
    if has_bias:
        x_ref, w_ref, b_ref, o_ref = refs
    else:
        x_ref, w_ref, o_ref = refs
        b_ref = None

    if K == 1:
        acc = jnp.dot(w_ref[...], x_ref[0], preferred_element_type=jnp.float32)
    else:
        # K shallow MXU dots directly on shifted views of the window — no
        # window stitch, no im2col slab, no VMEM scratch stores.
        acc = jnp.dot(w_ref[:, :C_in_pad], x_ref[0, 0, :, 0:L_TILE],
                      preferred_element_type=jnp.float32)
        for k in range(1, K):                     # K small & static -> unrolled
            off = k * dilation
            acc += jnp.dot(w_ref[:, k * C_in_pad:(k + 1) * C_in_pad],
                           x_ref[0, 0, :, off:off + L_TILE],
                           preferred_element_type=jnp.float32)
    if has_bias:
        acc = acc + b_ref[...]
    o_ref[0] = acc.astype(o_ref.dtype)


def time_delay(x, weight, bias, *, kernel_size, stride=1, padding=0, dilation=1,
               l_tile=1024, co_tile=128, compute_dtype=None):
    """Pallas TimeDelay forward. x:(N,C_in,T), weight:(C_out,C_in*K)."""
    N, C_in, T = x.shape
    C_out = weight.shape[0]
    K = kernel_size
    assert weight.shape == (C_out, C_in * K)
    out_dtype = x.dtype
    if compute_dtype is None:
        # bf16 MXU inputs + f32 accumulation: full-rate on v6e/v7x, fine on v5e.
        compute_dtype = jnp.bfloat16

    # stride > 1 fallback (unused by this module): decimate / unfold in the
    # wrapper, then run the pointwise (K==1) kernel — no in-kernel strided gather.
    if K > 1 and stride != 1:
        T_pad = T + 2 * padding
        L = (T_pad - dilation * (K - 1) - 1) // stride + 1
        xp = jnp.pad(x, ((0, 0), (0, 0), (padding, padding)))
        idx = jnp.arange(L)[:, None] * stride + jnp.arange(K)[None, :] * dilation
        patches = xp[:, :, idx]                               # (N, C_in, L, K)
        x_unf = patches.transpose(0, 1, 3, 2).reshape(N, C_in * K, L)
        return time_delay(x_unf, weight, bias, kernel_size=1,
                          l_tile=l_tile, co_tile=co_tile,
                          compute_dtype=compute_dtype)

    T_conv = T + 2 * padding
    HALO = dilation * (K - 1)
    L = T_conv - HALO                       # stride == 1
    assert L >= 1

    # ---- tiling: lane-dense L tiles (multiple of 128), 8-aligned C_out tiles,
    #      contraction channels zero-padded to a multiple of 128.
    L_TILE = _round_up(min(l_tile, _round_up(L, 128)), 128)
    CO_TILE = _round_up(min(co_tile, _round_up(C_out, 8)), 8)
    n_co = pl.cdiv(C_out, CO_TILE)
    C_out_pad = n_co * CO_TILE
    n_lt = pl.cdiv(L, L_TILE)
    # keep >= 2 grid steps when possible so both v7x TensorCores get work
    if N * n_co * n_lt == 1 and L_TILE >= 256:
        L_TILE = _round_up(L_TILE // 2, 128)
        n_lt = pl.cdiv(L, L_TILE)
    L_pad = n_lt * L_TILE
    C_in_pad = _round_up(C_in, 128)
    WIN = L_TILE + HALO
    has_bias = bias is not None

    # ---- wrapper data prep: conv padding, channel/time zero-pad, overlapping
    #      per-tile windows (main + right halo) built once in HBM.
    x_p = jnp.pad(x, ((0, 0), (0, C_in_pad - C_in), (padding, padding)))
    x_p = x_p.astype(compute_dtype)
    if K == 1:
        x_in = jnp.pad(x_p, ((0, 0), (0, 0), (0, L_pad - x_p.shape[2])))
        x_spec = pl.BlockSpec((1, C_in_pad, L_TILE), lambda n, lt, co: (n, 0, lt))
        x_tile_cols = L_TILE
    else:
        T_need = n_lt * L_TILE + HALO
        x_ext = jnp.pad(x_p, ((0, 0), (0, 0), (0, T_need - x_p.shape[2])))
        widx = jnp.arange(n_lt)[:, None] * L_TILE + jnp.arange(WIN)[None, :]
        x_in = x_ext[:, :, widx].transpose(0, 2, 1, 3)   # (N, n_lt, C_in_pad, WIN)
        x_spec = pl.BlockSpec((1, 1, C_in_pad, WIN), lambda n, lt, co: (n, lt, 0, 0))
        x_tile_cols = WIN

    # weight re-layout [o, c*K+k] -> [o, k*C_in_pad + c]
    # TODO(synk): w_packed can be precomputed once per layer when weights are
    #             reused across many forward calls (pure wrapper overhead here).
    w3 = weight.reshape(C_out, C_in, K).transpose(0, 2, 1)      # (C_out, K, C_in)
    w3 = jnp.pad(w3, ((0, C_out_pad - C_out), (0, 0), (0, C_in_pad - C_in)))
    w_packed = w3.reshape(C_out_pad, K * C_in_pad).astype(compute_dtype)

    in_specs = [x_spec,
                pl.BlockSpec((CO_TILE, K * C_in_pad), lambda n, lt, co: (co, 0))]
    inputs = [x_in, w_packed]
    if has_bias:
        b2 = jnp.pad(bias.astype(jnp.float32), (0, C_out_pad - C_out))
        b2 = b2.reshape(C_out_pad, 1)
        in_specs.append(pl.BlockSpec((CO_TILE, 1), lambda n, lt, co: (co, 0)))
        inputs.append(b2)

    kern = partial(_timedelay_kernel, K=K, dilation=dilation,
                   C_in_pad=C_in_pad, L_TILE=L_TILE, has_bias=has_bias)

    # VMEM limit from the actual (double-buffered) tile footprint — v7x safe.
    cdt = jnp.dtype(compute_dtype).itemsize
    odt = jnp.dtype(out_dtype).itemsize
    x_tile_b = C_in_pad * x_tile_cols * cdt
    w_tile_b = CO_TILE * K * C_in_pad * cdt
    o_tile_b = CO_TILE * L_TILE * odt
    b_tile_b = CO_TILE * 4 if has_bias else 0
    footprint = 2 * (x_tile_b + w_tile_b + o_tile_b + b_tile_b)
    vmem_limit = min(max(int(footprint * 1.5) + (2 << 20), 16 << 20), 64 << 20)

    w_reads = 1 if n_co == 1 else N * n_lt
    bytes_accessed = (x_in.size * cdt + w_packed.size * cdt * w_reads
                      + N * C_out_pad * L_pad * odt
                      + (C_out_pad * 4 if has_bias else 0))
    cost = pl.CostEstimate(flops=2 * N * C_out_pad * K * C_in_pad * L_pad,
                           transcendentals=0, bytes_accessed=int(bytes_accessed))

    out = pl.pallas_call(
        kern,
        out_shape=jax.ShapeDtypeStruct((N, C_out_pad, L_pad), out_dtype),
        grid_spec=pltpu.PrefetchScalarGridSpec(
            num_scalar_prefetch=0,
            # co innermost: x window block index is constant across the co loop,
            # so the x tile stays resident and only weight tiles stream.
            grid=(N, n_lt, n_co),
            in_specs=in_specs,
            out_specs=pl.BlockSpec((1, CO_TILE, L_TILE),
                                   lambda n, lt, co: (n, co, lt)),
        ),
        compiler_params=pltpu.CompilerParams(
            dimension_semantics=("parallel", "parallel", "parallel"),
            vmem_limit_bytes=vmem_limit,
        ),
        cost_estimate=cost,
    )(*inputs)
    if C_out_pad == C_out and L_pad == L:
        return out
    return out[:, :C_out, :L]


# ---------------------------------------------------------------------------
# Pure-JAX reference for TimeDelay (mirrors F.pad + F.unfold + F.linear).
# ---------------------------------------------------------------------------
def time_delay_ref(x, weight, bias, *, kernel_size, stride=1, padding=0,
                   dilation=1, **_):
    N, C_in, T = x.shape
    K = kernel_size
    x_pad = jnp.pad(x, ((0, 0), (0, 0), (padding, padding)))
    T_pad = T + 2 * padding
    L = (T_pad - dilation * (K - 1) - 1) // stride + 1
    idx = jnp.arange(L)[:, None] * stride + jnp.arange(K)[None, :] * dilation
    patches = x_pad[:, :, idx]                            # (N, C_in, L, K)
    patches = patches.transpose(0, 2, 1, 3).reshape(N, L, C_in * K)
    out = patches @ weight.T
    if bias is not None:
        out = out + bias
    return out.transpose(0, 2, 1)                         # (N, C_out, L)


# ---------------------------------------------------------------------------
# Plain-JAX glue for the rest of MultiBranchDenseTDNNLayer.
# ---------------------------------------------------------------------------
# TODO(synk): BatchNorm1d is implemented in inference mode (running stats);
#             training-mode batch statistics, torch.utils.checkpoint and the
#             prelu/batchnorm_ config_str variants are not reproduced here.
def batchnorm_relu(x, p, eps=1e-5):
    inv = jax.lax.rsqrt(p["var"] + eps) * p["gamma"]
    y = (x - p["mean"][None, :, None]) * inv[None, :, None] + p["beta"][None, :, None]
    return jnp.maximum(y, 0.0)


def high_order_stats_pooling(x, eps=0.01):
    mean = jnp.mean(x, axis=-1)
    std = jnp.sqrt(jnp.var(x, axis=-1, ddof=1))           # unbiased, like torch
    norm = (x - mean[..., None]) / jnp.maximum(std, eps)[..., None]
    skew = jnp.mean(norm ** 3, axis=-1)
    kurt = jnp.mean(norm ** 4, axis=-1)
    return jnp.concatenate([mean, std, skew, kurt], axis=-1)   # (N, 4C)


def stats_select(branch_outs, p, null=False):
    f = jnp.stack(branch_outs, axis=1)                    # (N, B, C, L)
    x = jnp.sum(f, axis=1)                                # (N, C, L)
    h = high_order_stats_pooling(x) @ p["w1"].T + p["b1"] # (N, C//r)
    s = jnp.stack([h @ w.T + b for w, b in p["branch"]], axis=1)
    s = jax.nn.softmax(s, axis=1)[..., None]              # (N, B', C, 1)
    if null:
        s = s[:, :-1]
    return jnp.sum(f * s, axis=1)                         # (N, C, L)


def multibranch_dense_tdnn_layer(params, x, *, use_pallas=True, compute_dtype=None):
    td = partial(time_delay, compute_dtype=compute_dtype) if use_pallas else time_delay_ref
    K = params["kernel_size"]
    # bn_function: nonlinear1 -> linear1 (pointwise 1x1, bias-free) — the 1x1
    # projection reuses the same Pallas kernel with kernel_size=1.
    h = batchnorm_relu(x, params["bn1"])
    h = td(h, params["w_lin1"], None, kernel_size=1)
    h = batchnorm_relu(h, params["bn2"])
    branches = []
    for w_b, b_b, d in zip(params["w_td"], params["b_td"], params["dilations"]):
        pad = (K - 1) // 2 * d
        branches.append(td(h, w_b, b_b, kernel_size=K, stride=params["stride"],
                           padding=pad, dilation=d))
    return stats_select(branches, params["select"], null=params["null"])


def init_params(key, *, in_channels, out_channels, bn_channels, kernel_size,
                dilations, stride=1, bias=False, null=False, reduction=1):
    ks = jax.random.split(key, 16)

    def normal(k, shape, std=1.0):
        return std * jax.random.normal(k, shape, dtype=jnp.float32)

    C = out_channels
    B = len(dilations) + (1 if null else 0)
    hid = out_channels // reduction
    std_td = 1.0 / math.sqrt(out_channels)
    return dict(
        kernel_size=kernel_size, dilations=tuple(dilations), stride=stride,
        null=null,
        bn1=dict(gamma=1.0 + 0.1 * normal(ks[0], (in_channels,)),
                 beta=0.1 * normal(ks[1], (in_channels,)),
                 mean=0.1 * normal(ks[2], (in_channels,)),
                 var=jnp.abs(normal(ks[3], (in_channels,))) + 0.5),
        w_lin1=normal(ks[4], (bn_channels, in_channels), 1.0 / math.sqrt(in_channels)),
        bn2=dict(gamma=1.0 + 0.1 * normal(ks[5], (bn_channels,)),
                 beta=0.1 * normal(ks[6], (bn_channels,)),
                 mean=0.1 * normal(ks[7], (bn_channels,)),
                 var=jnp.abs(normal(ks[8], (bn_channels,))) + 0.5),
        w_td=[normal(jax.random.fold_in(ks[9], i),
                     (out_channels, bn_channels * kernel_size), std_td)
              for i in range(len(dilations))],
        b_td=[(normal(jax.random.fold_in(ks[10], i), (out_channels,), std_td)
               if bias else None) for i in range(len(dilations))],
        select=dict(
            w1=normal(ks[11], (hid, 4 * C), 1.0 / math.sqrt(4 * C)),
            b1=0.1 * normal(ks[12], (hid,)),
            branch=[(normal(jax.random.fold_in(ks[13], i), (C, hid),
                            1.0 / math.sqrt(hid)),
                     0.1 * normal(jax.random.fold_in(ks[14], i), (C,)))
                    for i in range(B)],
        ),
    )


if __name__ == "__main__":
    key = jax.random.PRNGKey(0)
    k_p, k_x, k_w, k_b, k_x2, k_w2 = jax.random.split(key, 6)

    # ---- 1) standalone TimeDelay kernel: bias + dilation, f32 compute -------
    N, C_in, T = 2, 24, 50
    C_out, K, dil = 40, 3, 2
    std = 1.0 / math.sqrt(C_out)
    w = std * jax.random.normal(k_w, (C_out, C_in * K), dtype=jnp.float32)
    b = std * jax.random.normal(k_b, (C_out,), dtype=jnp.float32)
    xt = jax.random.normal(k_x, (N, C_in, T), dtype=jnp.float32)
    ref = time_delay_ref(xt, w, b, kernel_size=K, stride=1, padding=dil, dilation=dil)
    out = time_delay(xt, w, b, kernel_size=K, stride=1, padding=dil, dilation=dil,
                     compute_dtype=jnp.float32)
    out = jax.block_until_ready(out)
    assert out.shape == ref.shape, (out.shape, ref.shape)
    assert jnp.allclose(out, ref, atol=2e-5, rtol=2e-5), \
        float(jnp.max(jnp.abs(out - ref)))

    # ---- 2) multi-tile grids (L / C_out tiling + cross-tile halo windows) ---
    N2, C_in2, T2, C_out2 = 1, 16, 300, 72
    w2 = jax.random.normal(k_w2, (C_out2, C_in2 * K), dtype=jnp.float32) / math.sqrt(C_out2)
    x2 = jax.random.normal(k_x2, (N2, C_in2, T2), dtype=jnp.float32)
    ref2 = time_delay_ref(x2, w2, None, kernel_size=K, padding=2, dilation=2)
    # small tiles: n_lt=3, n_co=3
    out2 = time_delay(x2, w2, None, kernel_size=K, padding=2, dilation=2,
                      l_tile=128, co_tile=32, compute_dtype=jnp.float32)
    out2 = jax.block_until_ready(out2)
    assert jnp.allclose(out2, ref2, atol=2e-5, rtol=2e-5), \
        float(jnp.max(jnp.abs(out2 - ref2)))
    # default tiles: exercises the single-step -> split-for-2-TC heuristic
    out2b = time_delay(x2, w2, None, kernel_size=K, padding=2, dilation=2,
                       compute_dtype=jnp.float32)
    out2b = jax.block_until_ready(out2b)
    assert jnp.allclose(out2b, ref2, atol=2e-5, rtol=2e-5), \
        float(jnp.max(jnp.abs(out2b - ref2)))

    # ---- 3) default bf16-compute path (f32 accumulation) --------------------
    out_bf16 = time_delay(xt, w, b, kernel_size=K, padding=dil, dilation=dil)
    out_bf16 = jax.block_until_ready(out_bf16)
    assert jnp.allclose(out_bf16, ref, atol=1e-1, rtol=1e-1), \
        float(jnp.max(jnp.abs(out_bf16 - ref)))

    # ---- 4) stride>1 fallback (wrapper unfold -> pointwise kernel) ----------
    ref_s = time_delay_ref(xt, w, b, kernel_size=K, stride=2, padding=dil, dilation=dil)
    out_s = time_delay(xt, w, b, kernel_size=K, stride=2, padding=dil, dilation=dil,
                       compute_dtype=jnp.float32)
    out_s = jax.block_until_ready(out_s)
    assert jnp.allclose(out_s, ref_s, atol=2e-5, rtol=2e-5), \
        float(jnp.max(jnp.abs(out_s - ref_s)))

    # ---- 5) full MultiBranchDenseTDNNLayer forward ---------------------------
    in_channels, bn_channels, out_channels = 32, 64, 48
    Tm, Km, dilations = 40, 3, (1, 3)
    params = init_params(k_p, in_channels=in_channels, out_channels=out_channels,
                         bn_channels=bn_channels, kernel_size=Km,
                         dilations=dilations, bias=False, null=False, reduction=1)
    xm = jax.random.normal(jax.random.fold_in(key, 7), (2, in_channels, Tm),
                           dtype=jnp.float32)
    y_ref = multibranch_dense_tdnn_layer(params, xm, use_pallas=False)
    y = multibranch_dense_tdnn_layer(params, xm, use_pallas=True,
                                     compute_dtype=jnp.float32)
    y = jax.block_until_ready(y)
    assert y.shape == (2, out_channels, Tm), y.shape
    assert jnp.allclose(y, y_ref, atol=5e-4, rtol=5e-4), \
        float(jnp.max(jnp.abs(y - y_ref)))
    # default (bf16) path: run + sanity
    y_bf16 = multibranch_dense_tdnn_layer(params, xm, use_pallas=True)
    y_bf16 = jax.block_until_ready(y_bf16)
    assert y_bf16.shape == (2, out_channels, Tm)
    assert bool(jnp.all(jnp.isfinite(y_bf16)))

    print("KERNEL_OK")
</pallas_src>

<mosaic_0001>
module attributes {stable_mosaic.version = 11 : i64} {
  func.func @_timedelay_kernel(%arg0: i32, %arg1: i32, %arg2: i32, %arg3: memref<1x1x128x132xf32, #tpu.memory_space<vmem>>, %arg4: memref<40x384xf32, #tpu.memory_space<vmem>>, %arg5: memref<40x1xf32, #tpu.memory_space<vmem>>, %arg6: memref<1x40x128xf32, #tpu.memory_space<vmem>>) attributes {dimension_semantics = [#tpu.dimension_semantics<parallel>, #tpu.dimension_semantics<parallel>, #tpu.dimension_semantics<parallel>], iteration_bounds = array<i64: 2, 1, 1>, scalar_prefetch = 0 : i64, scratch_operands = 0 : i64, tpu.core_type = #tpu.core_type<tc>, window_params = [{transform_indices = @transform_0, window_bounds = array<i64: 1, 1, 128, 132>}, {transform_indices = @transform_1, window_bounds = array<i64: 40, 384>}, {transform_indices = @transform_2, window_bounds = array<i64: 40, 1>}, {transform_indices = @transform_3, window_bounds = array<i64: 1, 40, 128>}]} {
    %c0 = arith.constant 0 : index
    %c0_0 = arith.constant 0 : index
    %0 = vector.load %arg4[%c0, %c0_0] : memref<40x384xf32, #tpu.memory_space<vmem>>, vector<40x128xf32>
    %c0_1 = arith.constant 0 : index
    %c0_2 = arith.constant 0 : index
    %c0_3 = arith.constant 0 : index
    %c0_4 = arith.constant 0 : index
    %1 = vector.load %arg3[%c0_1, %c0_2, %c0_3, %c0_4] : memref<1x1x128x132xf32, #tpu.memory_space<vmem>>, vector<1x1x128x128xf32>
    %2 = vector.shape_cast %1 : vector<1x1x128x128xf32> to vector<128x128xf32>
    %cst = arith.constant dense<0.000000e+00> : vector<40x128xf32>
    %3 = tpu.matmul %0, %2, %cst {dimension_numbers = #tpu.dot_dimension_numbers<[1], [0], [0], [1], [0, 0, 1, 1], [], []>} : vector<40x128xf32>, vector<128x128xf32>, vector<40x128xf32> -> vector<40x128xf32>
    %c0_5 = arith.constant 0 : index
    %c128 = arith.constant 128 : index
    %4 = vector.load %arg4[%c0_5, %c128] : memref<40x384xf32, #tpu.memory_space<vmem>>, vector<40x128xf32>
    %c0_6 = arith.constant 0 : index
    %c0_7 = arith.constant 0 : index
    %c0_8 = arith.constant 0 : index
    %c2 = arith.constant 2 : index
    %5 = vector.load %arg3[%c0_6, %c0_7, %c0_8, %c2] : memref<1x1x128x132xf32, #tpu.memory_space<vmem>>, vector<1x1x128x128xf32>
    %6 = vector.shape_cast %5 : vector<1x1x128x128xf32> to vector<128x128xf32>
    %cst_9 = arith.constant dense<0.000000e+00> : vector<40x128xf32>
    %7 = tpu.matmul %4, %6, %cst_9 {dimension_numbers = #tpu.dot_dimension_numbers<[1], [0], [0], [1], [0, 0, 1, 1], [], []>} : vector<40x128xf32>, vector<128x128xf32>, vector<40x128xf32> -> vector<40x128xf32>
    %8 = arith.addf %3, %7 : vector<40x128xf32>
    %c0_10 = arith.constant 0 : index
    %c256 = arith.constant 256 : index
    %9 = vector.load %arg4[%c0_10, %c256] : memref<40x384xf32, #tpu.memory_space<vmem>>, vector<40x128xf32>
    %c0_11 = arith.constant 0 : index
    %c0_12 = arith.constant 0 : index
    %c0_13 = arith.constant 0 : index
    %c4 = arith.constant 4 : index
    %10 = vector.load %arg3[%c0_11, %c0_12, %c0_13, %c4] : memref<1x1x128x132xf32, #tpu.memory_space<vmem>>, vector<1x1x128x128xf32>
    %11 = vector.shape_cast %10 : vector<1x1x128x128xf32> to vector<128x128xf32>
    %cst_14 = arith.constant dense<0.000000e+00> : vector<40x128xf32>
    %12 = tpu.matmul %9, %11, %cst_14 {dimension_numbers = #tpu.dot_dimension_numbers<[1], [0], [0], [1], [0, 0, 1, 1], [], []>} : vector<40x128xf32>, vector<128x128xf32>, vector<40x128xf32> -> vector<40x128xf32>
    %13 = arith.addf %8, %12 : vector<40x128xf32>
    %c0_15 = arith.constant 0 : index
    %c0_16 = arith.constant 0 : index
    %14 = vector.load %arg5[%c0_15, %c0_16] : memref<40x1xf32, #tpu.memory_space<vmem>>, vector<40x1xf32>
    %15 = vector.broadcast %14 : vector<40x1xf32> to vector<40x128xf32>
    %16 = arith.addf %13, %15 : vector<40x128xf32>
    %c0_17 = arith.constant 0 : index
    %c0_18 = arith.constant 0 : index
    %c0_19 = arith.constant 0 : index
    %17 = vector.load %arg6[%c0_17, %c0_18, %c0_19] : memref<1x40x128xf32, #tpu.memory_space<vmem>>, vector<1x40x128xf32>
    %18 = vector.shape_cast %17 : vector<1x40x128xf32> to vector<40x128xf32>
    %19 = vector.shape_cast %16 : vector<40x128xf32> to vector<1x40x128xf32>
    tpu.vector_store %arg6[%c0_17, %c0_18, %c0_19], %19 {strides = array<i32>} : memref<1x40x128xf32, #tpu.memory_space<vmem>>, vector<1x40x128xf32>,
    return
  }
  func.func @transform_0(%arg0: i32, %arg1: i32, %arg2: i32) -> (i32, i32, i32, i32) {
    %c0_i32 = arith.constant 0 : i32
    %c0_i32_0 = arith.constant 0 : i32
    %c0_i32_1 = arith.constant 0 : i32
    return %arg0, %arg1, %c0_i32, %c0_i32_0 : i32, i32, i32, i32
  }
  func.func @transform_1(%arg0: i32, %arg1: i32, %arg2: i32) -> (i32, i32) {
    %c0_i32 = arith.constant 0 : i32
    %c0_i32_0 = arith.constant 0 : i32
    return %arg2, %c0_i32 : i32, i32
  }
  func.func @transform_2(%arg0: i32, %arg1: i32, %arg2: i32) -> (i32, i32) {
    %c0_i32 = arith.constant 0 : i32
    %c0_i32_0 = arith.constant 0 : i32
    return %arg2, %c0_i32 : i32, i32
  }
  func.func @transform_3(%arg0: i32, %arg1: i32, %arg2: i32) -> (i32, i32, i32) {
    %c0_i32 = arith.constant 0 : i32
    return %arg0, %arg2, %arg1 : i32, i32, i32
  }
}

</mosaic_0001>

<bundles_post_ra>
// kernel: tpu_custom_call.1
= control target key start
LH: loop header
LB: loop body
LE: loop exit
PB: predicated region body
PF: predicated region fallthrough
CT: control target
= control target key end

     0   :  { %8 = vsyncpa [#allocation3], 0  ;;  %s1910_s0 = inlined_call_operand.vmem [shape: f32[2,1,128,132], index: 0, kind: input, shape index: {}]   ;;  %s1911_s1 = inlined_call_operand.vmem [shape: f32[40,384], index: 1, kind: input, shape index: {}]   ;;  %s1912_s2 = inlined_call_operand.vmem [shape: f32[40,1], index: 2, kind: input, shape index: {}]   ;;  %s1913_s3 = inlined_call_operand.hbm [shape: f32[2,40,128], index: 3, kind: output, shape index: {}]  }
   0x1   :  { %10 = vsyncpa [#allocation3 + $0x1], 0  ;;  %s1396_s12 = smov 0   ;;  %s1398_s13 = smov 0  }
   0x2   :  { %s1400_s14 = smov 0   ;;  %s1402_s15 = smov 0  }
   0x3   :  { %s1404_s16 = smov 0   ;;  %s1406_s17 = smov 0  }
   0x4 LB: > { %s975_s18 = sadd.s32 4294967295, %s1366_s17   ;;  %s976_s19 = sadd.s32 4294967294, %s1366_s17   ;;  %s1366_s17 = sphi %s1406_s17, %s16_s17   ;;  %s1362_s16 = sphi %s1404_s16, %s1920_s16   ;;  %s1358_s15 = sphi %s1402_s15, %s1919_s15   ;;  %s1354_s14 = sphi %s1400_s14, %s1918_s14   ;;  %s1350_s13 = sphi %s1398_s13, %s1917_s13   ;;  %s1346_s12 = sphi %s1396_s12, %s1916_s12  }
   0x5   : > { %s35_s20 = sadd.s32 1, %s1362_s16  ;;  %s126_s21 = sadd.s32 1, %s1354_s14 }
   0x6   : > { %p37_p0 = scmp.ge.s32.totalorder %s35_s20, 2  ;;  %p136_p1 = scmp.ne.s32.totalorder %s1354_s14, %s1350_s13 }
   0x7   : > { %p137_p2 = scmp.eq.s32.totalorder %s975_s18, 1  ;;  %p142_p3 = scmp.ne.s32.totalorder %s1350_s13, %s1346_s12 }
   0x8   : > { %s1922_s20 = smov (%p37_p0, %s35_s20), 0  ;;  %p143_p5 = scmp.eq.s32.totalorder %s976_s19, 1 }
   0x9   : > { %p1436_p4 = por %p137_p2, %p136_p1  ;;  %s119_s23 = ssub.s32 %s1362_s16, %s1922_s20 }
   0xa   : > { %p981_p6 = scmp.ge.s32.totalorder %s1366_s17, 1  ;;  %p124_p7 = scmp.eq.s32.totalorder %s119_s23, 0 }
   0xb   : > { %p1443_p8 = por %p143_p5, %p142_p3  ;;  %p192_p9 = scmp.lt.s32.totalorder %s1366_s17, 3 }
   0xc   : > { %s1449_s25 = scalar_select %p124_p7, %s1354_s14, %s126_s21  }
   0xd   : > { %p193_p10 = pnand %p981_p6, %p192_p9 }
   0xe   : > { %p231_p11 = scmp.lt.s32.totalorder (!%p193_p10), %s1358_s15, 1  ;;  %s1369_s4 = smov (!%p193_p10), 126  }
   0xf   : > { %196 = sbr.rel (%p193_p10) target bundleno = 486 (0x1e6), region = 32  ;;  %s1371_s7 = smov (!%p193_p10), 124  }
  0x10   : > { %s228_s18 = sand.u32 (!%p193_p10), 1, %s1350_s13   ;;  %s1225_s23 = smul.u32 (!%p193_p10), 640, %s1358_s15 }
  0x11   : > { %s1224_s19 = smul.u32 (!%p193_p10), 40, %s228_s18 }
  0x12   : > { %s1861_s29 = scalar_lea.hbm (!%p193_p10), %s1913_s3, %s1225_s23 }
  0x13   : > { %s230_s21 = scalar_lea.vmem (!%p193_p10), [#allocation2], %s1224_s19 }
  0x14   : > { %v1368_v0 = vmov 0.0   ;;  %s232_s26 = scalar_select %p231_p11, %s1358_s15, 1  ;;  %v254_v31 = vld [vmem:[%s1911_s1] sm:$0xff]  ;;  %vm1370_vm0 = vmmov 0   ;;  %v255_v34 = vld [vmem:[%s1911_s1 + $0x18] sm:$0xff]  ;;  %v256_v35 = vld [vmem:[%s1911_s1 + $0x30] sm:$0xff] }
  0x15   : > { %1051 = vmatprep.subr.mxu0 %v1368_v0  ;;  %1098 = vmatprep.subr.mxu1 %v1368_v0  ;;  %v257_v36 = vld [vmem:[%s1911_s1 + $0x48] sm:$0xff]  ;;  %v258_v37 = vld [vmem:[%s1911_s1 + $0x60] sm:$0xff]  ;;  %vm392_vm1 = vcmask 1031168   ;;  %v1372_v47 = vmov 0   ;;  %v804_v53 = vld [vmem:[%s1912_s2 + $0x10] sm:$0xff]  ;;  %vm674_vm2 = vcmask 1014784  }
  0x16   : > { %s987_s27 = sshll.u32 %s232_s26, 8  ;;  %1083 = vmatprep.mubr.msk.f32.mxu0 %vm1370_vm0, %v1368_v0  ;;  %1130 = vmatprep.mubr.msk.f32.mxu1 %vm1370_vm0, %v1368_v0  ;;  %v803_v48 = vld [vmem:[%s1912_s2 + $0x8] sm:$0xff]  ;;  %v802_v51 = vld [vmem:[%s1912_s2] sm:$0xff]  ;;  %v805_v56 = vld [vmem:[%s1912_s2 + $0x18] sm:$0xff]  ;;  %s859_s26 = sshll.u32 %s230_s21, 4  ;;  %s1856_s26 = int_to_ptr.vmem [resolvable:$true] %s859_s26 }
  0x17   : > { %s1458_s30 = scalar_lea.vmem %s1910_s0, %s987_s27  ;;  %1289 = vset.pattern.permute.xlu1 %v1372_v47  ;;  %1288 = vset.pattern.permute.xlu0 %v1372_v47  ;;  %v806_v58 = vld [vmem:[%s1912_s2 + $0x20] sm:$0xff]  ;;  %s1865_s15 = scalar_lea.sflag [#allocation3], %s228_s18 }
  0x18   : > { %v1461_v1 = vld [vmem:[%s1458_s30 + $0xf0] sm:$0xff]  ;;  %v1464_v2 = vld [vmem:[%s1458_s30 + $0xe0] sm:$0xff]  ;;  %v1471_v3 = vld [vmem:[%s1458_s30 + $0xf8] sm:$0xff] }
  0x19   : > { %388 = vrot.lane.b32.xlu0 %v1461_v1, %s1369_s4  ;;  %384 = vrot.lane.b32.xlu1 %v1464_v2, %s1369_s4  ;;  %v1474_v4 = vld [vmem:[%s1458_s30 + $0xe8] sm:$0xff]  ;;  %v1484_v5 = vld [vmem:[%s1458_s30 + $0xd8] sm:$0xff] }
  0x1a   : > { %1099 = vmatpush3.msra.mxu1 %v1461_v1  ;;  %v1487_v6 = vld [vmem:[%s1458_s30 + $0xd0] sm:$0xff]  ;;  %v1497_v7 = vld [vmem:[%s1458_s30 + $0xc0] sm:$0xff]  ;;  %v1500_v8 = vld [vmem:[%s1458_s30 + $0xc8] sm:$0xff] }
  0x1b   : > { %1100 = vmatprep.subr.mxu1 %v1368_v0  ;;  %v1504_v9 = vld [vmem:[%s1458_s30 + $0xb0] sm:$0xff]  ;;  %v1513_v10 = vld [vmem:[%s1458_s30 + $0xb8] sm:$0xff]  ;;  %v1516_v11 = vld [vmem:[%s1458_s30 + $0xa0] sm:$0xff] }
  0x1c   : > { %1101 = vmatpush3.msra.mxu1 %v1464_v2  ;;  %v1526_v12 = vld [vmem:[%s1458_s30 + $0x90] sm:$0xff]  ;;  %v1529_v13 = vld [vmem:[%s1458_s30 + $0xa8] sm:$0xff]  ;;  %v1533_v14 = vld [vmem:[%s1458_s30 + $0x80] sm:$0xff] }
  0x1d   : > { %390 = vrot.lane.b32.xlu0 %v1471_v3, %s1369_s4  ;;  %386 = vrot.lane.b32.xlu1 %v1474_v4, %s1369_s4  ;;  %v1542_v15 = vld [vmem:[%s1458_s30 + $0x98] sm:$0xff]  ;;  %v1545_v16 = vld [vmem:[%s1458_s30 + $0x70] sm:$0xff] }
  0x1e   : > { %1102 = vmatprep.subr.mxu1 %v1368_v0  ;;  %v1555_v17 = vld [vmem:[%s1458_s30 + $0x60] sm:$0xff]  ;;  %v1558_v18 = vld [vmem:[%s1458_s30 + $0x88] sm:$0xff]  ;;  %v1562_v19 = vld [vmem:[%s1458_s30 + $0x50] sm:$0xff] }
  0x1f   : > { %1103 = vmatpush3.msra.mxu1 %v1487_v6  ;;  %v287_v20 = vld [vmem:[%s1458_s30 + $0x78] sm:$0xff]  ;;  %v1572_v21 = vld [vmem:[%s1458_s30 + $0x40] sm:$0xff]  ;;  %v1581_v22 = vld [vmem:[%s1458_s30 + $0x30] sm:$0xff] }
  0x20   : > { %1104 = vmatprep.subr.mxu1 %v1368_v0  ;;  %v286_v23 = vld [vmem:[%s1458_s30 + $0x68] sm:$0xff]  ;;  %v1586_v24 = vld [vmem:[%s1458_s30 + $0x20] sm:$0xff]  ;;  %v285_v25 = vld [vmem:[%s1458_s30 + $0x58] sm:$0xff] }
  0x21   : > { %382 = vrot.lane.b32.xlu1 %v1484_v5, %s1369_s4  ;;  %380 = vrot.lane.b32.xlu0 %v1487_v6, %s1369_s4  ;;  %v1595_v26 = vld [vmem:[%s1458_s30 + $0x10] sm:$0xff]  ;;  %v1604_v27 = vld [vmem:[%s1458_s30] sm:$0xff] }
  0x22   : > { %1105 = vmatpush3.msra.mxu1 %v1497_v7  ;;  %v284_v28 = vld [vmem:[%s1458_s30 + $0x48] sm:$0xff]  ;;  %v283_v29 = vld [vmem:[%s1458_s30 + $0x38] sm:$0xff] }
  0x23   : > { %1106 = vmatprep.subr.mxu1 %v1368_v0  ;;  %v282_v30 = vld [vmem:[%s1458_s30 + $0x28] sm:$0xff]  ;;  %v281_v32 = vld [vmem:[%s1458_s30 + $0x18] sm:$0xff] }
  0x24   : > { %1107 = vmatpush3.msra.mxu1 %v1504_v9  ;;  %v280_v33 = vld [vmem:[%s1458_s30 + $0x8] sm:$0xff]  ;;  %s1290_s30 = scalar_lea.vmem %s1856_s26, 640 }
  0x25   : > { %378 = vrot.lane.b32.xlu1 %v1500_v8, %s1369_s4  ;;  %376 = vrot.lane.b32.xlu0 %v1497_v7, %s1369_s4  ;;  %p1291_p12 = scmp.ne.s32.totalorder %s1856_s26, %s1290_s30 }
  0x26   : > { %1108 = vmatprep.subr.mxu1 %v1368_v0 }
  0x27   : > { %1109 = vmatpush3.msra.mxu1 %v1516_v11  ;;  %p1292_p13 = pnand %p1291_p12, %p1436_p4 }
  0x28   : > { %1110 = vmatprep.subr.mxu1 %v1368_v0 }
  0x29   : > { %374 = vrot.lane.b32.xlu1 %v1513_v10, %s1369_s4  ;;  %372 = vrot.lane.b32.xlu0 %v1504_v9, %s1369_s4  ;;  %p1293_p0 = pneg %p1292_p13 }
  0x2a   : > { %1111 = vmatpush3.msra.mxu1 %v1526_v12 }
  0x2b   : > { %1112 = vmatprep.subr.mxu1 %v1368_v0 }
  0x2c   : > { %1113 = vmatpush3.msra.mxu1 %v1533_v14 }
  0x2d   : > { %370 = vrot.lane.b32.xlu1 %v1529_v13, %s1369_s4  ;;  %368 = vrot.lane.b32.xlu0 %v1516_v11, %s1369_s4 }
  0x2e   : > { %1114 = vmatprep.subr.mxu1 %v1368_v0 }
  0x2f   : > { %1115 = vmatpush3.msra.mxu1 %v1545_v16 }
  0x30   : > { %1116 = vmatprep.subr.mxu1 %v1368_v0 }
  0x31   : > { %366 = vrot.lane.b32.xlu1 %v1542_v15, %s1369_s4  ;;  %364 = vrot.lane.b32.xlu0 %v1526_v12, %s1369_s4 }
  0x32   : > { %1117 = vmatpush3.msra.mxu1 %v1555_v17 }
  0x33   : > { %1118 = vmatprep.subr.mxu1 %v1368_v0 }
  0x34   : > { %1119 = vmatpush3.msra.mxu1 %v1562_v19 }
  0x35   : > { %362 = vrot.lane.b32.xlu1 %v1558_v18, %s1369_s4  ;;  %360 = vrot.lane.b32.xlu0 %v1533_v14, %s1369_s4 }
  0x36   : > { %1120 = vmatprep.subr.mxu1 %v1368_v0 }
  0x37   : > { %1121 = vmatpush3.msra.mxu1 %v1572_v21 }
  0x38   : > { %1122 = vmatprep.subr.mxu1 %v1368_v0 }
  0x39   : > { %358 = vrot.lane.b32.xlu1 %v287_v20, %s1369_s4  ;;  %356 = vrot.lane.b32.xlu0 %v1545_v16, %s1369_s4 }
  0x3a   : > { %1123 = vmatpush3.msra.mxu1 %v1581_v22 }
  0x3b   : > { %1124 = vmatprep.subr.mxu1 %v1368_v0 }
  0x3c   : > { %1125 = vmatpush3.msra.mxu1 %v1586_v24 }
  0x3d   : > { %354 = vrot.lane.b32.xlu1 %v286_v23, %s1369_s4  ;;  %352 = vrot.lane.b32.xlu0 %v1555_v17, %s1369_s4 }
  0x3e   : > { %1126 = vmatprep.subr.mxu1 %v1368_v0 }
  0x3f   : > { %1127 = vmatpush3.msra.mxu1 %v1595_v26 }
  0x40   : > { %1128 = vmatprep.subr.mxu1 %v1368_v0 }
  0x41   : > { %350 = vrot.lane.b32.xlu1 %v285_v25, %s1369_s4  ;;  %348 = vrot.lane.b32.xlu0 %v1562_v19, %s1369_s4 }
  0x42   : > { %1129 = vmatpush3.msra.mxu1 %v1604_v27 }
  0x43   : > { %1192 = vmatprep.subr.mxu1 %v1368_v0  ;;  %1131 = vmatmul.mubr.f32.vlgmr.msra.gmra.mxu1 %v254_v31 }
  0x44   : > { %1133 = vmatprep.mubr.msk.f32.mxu1 %vm1370_vm0, %v1368_v0 }
  0x45   : > { %346 = vrot.lane.b32.xlu1 %v284_v28, %s1369_s4  ;;  %344 = vrot.lane.b32.xlu0 %v1572_v21, %s1369_s4 }
  0x47   : > { %1134 = vmatmul.mubr.f32.gmra.mxu1 %v255_v34 }
  0x48   : > { %1136 = vmatprep.mubr.msk.f32.mxu1 %vm1370_vm0, %v1368_v0 }
  0x49   : > { %342 = vrot.lane.b32.xlu1 %v283_v29, %s1369_s4  ;;  %340 = vrot.lane.b32.xlu0 %v1581_v22, %s1369_s4 }
  0x4b   : > { %1137 = vmatmul.mubr.f32.gmra.mxu1 %v256_v35 }
  0x4c   : > { %1139 = vmatprep.mubr.msk.f32.mxu1 %vm1370_vm0, %v1368_v0 }
  0x4d   : > { %338 = vrot.lane.b32.xlu1 %v282_v30, %s1369_s4  ;;  %336 = vrot.lane.b32.xlu0 %v1586_v24, %s1369_s4 }
  0x4f   : > { %1140 = vmatmul.mubr.f32.gmra.mxu1 %v257_v36 }
  0x50   : > { %1142 = vmatprep.mubr.msk.f32.mxu1 %vm1370_vm0, %v1368_v0 }
  0x51   : > { %334 = vrot.lane.b32.xlu1 %v281_v32, %s1369_s4  ;;  %332 = vrot.lane.b32.xlu0 %v1595_v26, %s1369_s4 }
  0x53   : > { %1143 = vmatmul.mubr.f32.gmra.mxu1 %v258_v37  ;;  %v277_v37 = vld [vmem:[%s1911_s1 + $0x38] sm:$0xff] }
  0x54   : > { %1186 = vmatprep.mubr.msk.f32.mxu1 %vm1370_vm0, %v1368_v0 }
  0x55   : > { %330 = vrot.lane.b32.xlu1 %v280_v33, %s1369_s4  ;;  %328 = vrot.lane.b32.xlu0 %v1604_v27, %s1369_s4  ;;  %s1373_s4 = smov [#allocation2]  }
  0x56   : > { %s1294_s5 = sshll.u32 %s1373_s4, 4  ;;  %s1295_s5 = int_to_ptr.vmem [resolvable:$false] %s1294_s5 }
  0x57   : > { %s1296_s6 = scalar_lea.vmem %s1295_s5, 1280  ;;  %p1297_p1 = scmp.lt.s32.totalorder %s1856_s26, %s1295_s5 }
  0x58   : > { %p1298_p2 = scmp.lt.s32.totalorder %s1296_s6, %s1290_s30 }
  0x59   : > { %672 = vrot.lane.b32.xlu1 %v1471_v3, %s1371_s7  ;;  %670 = vrot.lane.b32.xlu0 %v1461_v1, %s1371_s7 }
  0x5a   : > { %p1299_p3 = por %p1298_p2, %p1297_p1 }
  0x5c   : > { %p1300_p5 = pnand %p1299_p3, %p1293_p0 }
  0x5d   : > { %668 = vrot.lane.b32.xlu1 %v1474_v4, %s1371_s7  ;;  %666 = vrot.lane.b32.xlu0 %v1464_v2, %s1371_s7 }
  0x61   : > { %664 = vrot.lane.b32.xlu1 %v1484_v5, %s1371_s7  ;;  %662 = vrot.lane.b32.xlu0 %v1487_v6, %s1371_s7 }
  0x65   : > { %660 = vrot.lane.b32.xlu1 %v1500_v8, %s1371_s7  ;;  %658 = vrot.lane.b32.xlu0 %v1497_v7, %s1371_s7 }
  0x69   : > { %656 = vrot.lane.b32.xlu1 %v1513_v10, %s1371_s7  ;;  %654 = vrot.lane.b32.xlu0 %v1504_v9, %s1371_s7 }
  0x6d   : > { %652 = vrot.lane.b32.xlu1 %v1529_v13, %s1371_s7  ;;  %650 = vrot.lane.b32.xlu0 %v1516_v11, %s1371_s7 }
  0x71   : > { %648 = vrot.lane.b32.xlu1 %v1542_v15, %s1371_s7  ;;  %646 = vrot.lane.b32.xlu0 %v1526_v12, %s1371_s7 }
  0x75   : > { %644 = vrot.lane.b32.xlu1 %v1558_v18, %s1371_s7  ;;  %642 = vrot.lane.b32.xlu0 %v1533_v14, %s1371_s7 }
  0x79   : > { %640 = vrot.lane.b32.xlu1 %v287_v20, %s1371_s7  ;;  %638 = vrot.lane.b32.xlu0 %v1545_v16, %s1371_s7 }
  0x7d   : > { %636 = vrot.lane.b32.xlu1 %v286_v23, %s1371_s7  ;;  %634 = vrot.lane.b32.xlu0 %v1555_v17, %s1371_s7 }
  0x81   : > { %632 = vrot.lane.b32.xlu1 %v285_v25, %s1371_s7  ;;  %630 = vrot.lane.b32.xlu0 %v1562_v19, %s1371_s7 }
  0x85   : > { %628 = vrot.lane.b32.xlu1 %v284_v28, %s1371_s7  ;;  %626 = vrot.lane.b32.xlu0 %v1572_v21, %s1371_s7  ;;  %v275_v28 = vld [vmem:[%s1911_s1 + $0x8] sm:$0xff] }
  0x89   : > { %624 = vrot.lane.b32.xlu1 %v283_v29, %s1371_s7  ;;  %622 = vrot.lane.b32.xlu0 %v1581_v22, %s1371_s7 }
  0x8b   : > { %v389_v38 = vpop.permute.xlu0 %388  ;;  %v385_v39 = vpop.permute.xlu1 %384 }
  0x8d   : > { %620 = vrot.lane.b32.xlu1 %v282_v30, %s1371_s7  ;;  %618 = vrot.lane.b32.xlu0 %v1586_v24, %s1371_s7 }
  0x8f   : > { %v391_v40 = vpop.permute.xlu0 %390  ;;  %v387_v41 = vpop.permute.xlu1 %386 }
  0x90   : > { %v408_v42 = vsel %vm392_vm1, %v389_v38, %v391_v40  ;;  %v407_v43 = vsel %vm392_vm1, %v385_v39, %v387_v41  ;;  %v278_v41 = vld [vmem:[%s1911_s1 + $0x50] sm:$0xff] }
  0x91   : > { %1052 = vmatpush3.msra.mxu0 %v408_v42  ;;  %616 = vrot.lane.b32.xlu1 %v281_v32, %s1371_s7 }
  0x92   : > { %614 = vrot.lane.b32.xlu0 %v1595_v26, %s1371_s7  ;;  %1053 = vmatprep.subr.mxu0 %v1368_v0 }
  0x93   : > { %1054 = vmatpush3.msra.mxu0 %v407_v43  ;;  %v383_v44 = vpop.permute.xlu1 %382  ;;  %v381_v45 = vpop.permute.xlu0 %380 }
  0x94   : > { %1055 = vmatprep.subr.mxu0 %v1368_v0  ;;  %v406_v46 = vsel %vm392_vm1, %v381_v45, %v383_v44  ;;  %v279_v45 = vld [vmem:[%s1911_s1 + $0x68] sm:$0xff] }
  0x95   : > { %612 = vrot.lane.b32.xlu1 %v280_v33, %s1371_s7  ;;  %1056 = vmatpush3.msra.mxu0 %v406_v46  ;;  %v276_v33 = vld [vmem:[%s1911_s1 + $0x20] sm:$0xff] }
  0x96   : > { %610 = vrot.lane.b32.xlu0 %v1604_v27, %s1371_s7  ;;  %1057 = vmatprep.subr.mxu0 %v1368_v0 }
  0x97   : > { %v379_v49 = vpop.permute.xlu1 %378  ;;  %v377_v50 = vpop.permute.xlu0 %376 }
  0x98   : > { %v405_v52 = vsel %vm392_vm1, %v377_v50, %v379_v49 }
  0x99   : > { %1058 = vmatpush3.msra.mxu0 %v405_v52  ;;  %814 = vperm.xlu1 %1289, %v803_v48  }
  0x9a   : > { %1059 = vmatprep.subr.mxu0 %v1368_v0  ;;  %809 = vperm.xlu0 %1288, %v802_v51  }
  0x9b   : > { %v375_v54 = vpop.permute.xlu1 %374  ;;  %v373_v55 = vpop.permute.xlu0 %372 }
  0x9c   : > { %v404_v57 = vsel %vm392_vm1, %v373_v55, %v375_v54 }
  0x9d   : > { %1060 = vmatpush3.msra.mxu0 %v404_v57  ;;  %819 = vperm.xlu1 %1289, %v804_v53  }
  0x9e   : > { %1061 = vmatprep.subr.mxu0 %v1368_v0  ;;  %824 = vperm.xlu0 %1288, %v805_v56  }
  0x9f   : > { %v371_v59 = vpop.permute.xlu1 %370  ;;  %v369_v60 = vpop.permute.xlu0 %368 }
  0xa0   : > { %v403_v61 = vsel %vm392_vm1, %v369_v60, %v371_v59 }
  0xa1   : > { %1062 = vmatpush3.msra.mxu0 %v403_v61  ;;  %829 = vperm.xlu1 %1289, %v806_v58  }
  0xa2   : > { %1063 = vmatprep.subr.mxu0 %v1368_v0 }
  0xa3   : > { %v367_v62 = vpop.permute.xlu1 %366  ;;  %v365_v63 = vpop.permute.xlu0 %364 }
  0xa4   : > { %v402_v1 = vsel %vm392_vm1, %v365_v63, %v367_v62 }
  0xa5   : > { %1064 = vmatpush3.msra.mxu0 %v402_v1 }
  0xa6   : > { %1065 = vmatprep.subr.mxu0 %v1368_v0 }
  0xa7   : > { %v363_v2 = vpop.permute.xlu1 %362  ;;  %v361_v3 = vpop.permute.xlu0 %360 }
  0xa8   : > { %v401_v4 = vsel %vm392_vm1, %v361_v3, %v363_v2 }
  0xa9   : > { %1066 = vmatpush3.msra.mxu0 %v401_v4 }
  0xaa   : > { %1067 = vmatprep.subr.mxu0 %v1368_v0 }
  0xab   : > { %v359_v5 = vpop.permute.xlu1 %358  ;;  %v357_v6 = vpop.permute.xlu0 %356 }
  0xac   : > { %v400_v7 = vsel %vm392_vm1, %v357_v6, %v359_v5 }
  0xad   : > { %1068 = vmatpush3.msra.mxu0 %v400_v7 }
  0xae   : > { %1069 = vmatprep.subr.mxu0 %v1368_v0 }
  0xaf   : > { %v355_v8 = vpop.permute.xlu1 %354  ;;  %v353_v9 = vpop.permute.xlu0 %352 }
  0xb0   : > { %v399_v10 = vsel %vm392_vm1, %v353_v9, %v355_v8 }
  0xb1   : > { %1070 = vmatpush3.msra.mxu0 %v399_v10 }
  0xb2   : > { %1071 = vmatprep.subr.mxu0 %v1368_v0 }
  0xb3   : > { %v351_v11 = vpop.permute.xlu1 %350  ;;  %v349_v12 = vpop.permute.xlu0 %348 }
  0xb4   : > { %v398_v13 = vsel %vm392_vm1, %v349_v12, %v351_v11 }
  0xb5   : > { %1072 = vmatpush3.msra.mxu0 %v398_v13 }
  0xb6   : > { %1073 = vmatprep.subr.mxu0 %v1368_v0 }
  0xb7   : > { %v347_v14 = vpop.permute.xlu1 %346  ;;  %v345_v15 = vpop.permute.xlu0 %344 }
  0xb8   : > { %v397_v16 = vsel %vm392_vm1, %v345_v15, %v347_v14 }
  0xb9   : > { %1074 = vmatpush3.msra.mxu0 %v397_v16 }
  0xba   : > { %1075 = vmatprep.subr.mxu0 %v1368_v0 }
  0xbb   : > { %v343_v17 = vpop.permute.xlu1 %342  ;;  %v341_v18 = vpop.permute.xlu0 %340 }
  0xbc   : > { %v396_v19 = vsel %vm392_vm1, %v341_v18, %v343_v17  ;;  %v605_v18 = vld [vmem:[%s1911_s1 + $0x10] sm:$0xff] }
  0xbd   : > { %1076 = vmatpush3.msra.mxu0 %v396_v19  ;;  %v608_v19 = vld [vmem:[%s1911_s1 + $0x58] sm:$0xff] }
  0xbe   : > { %1077 = vmatprep.subr.mxu0 %v1368_v0 }
  0xbf   : > { %v339_v20 = vpop.permute.xlu1 %338  ;;  %v337_v21 = vpop.permute.xlu0 %336 }
  0xc0   : > { %v395_v22 = vsel %vm392_vm1, %v337_v21, %v339_v20  ;;  %v606_v21 = vld [vmem:[%s1911_s1 + $0x28] sm:$0xff] }
  0xc1   : > { %1078 = vmatpush3.msra.mxu0 %v395_v22  ;;  %v609_v22 = vld [vmem:[%s1911_s1 + $0x70] sm:$0xff] }
  0xc2   : > { %1079 = vmatprep.subr.mxu0 %v1368_v0 }
  0xc3   : > { %v335_v23 = vpop.permute.xlu1 %334  ;;  %v333_v24 = vpop.permute.xlu0 %332 }
  0xc4   : > { %v394_v25 = vsel %vm392_vm1, %v333_v24, %v335_v23  ;;  %v607_v24 = vld [vmem:[%s1911_s1 + $0x40] sm:$0xff] }
  0xc5   : > { %1080 = vmatpush3.msra.mxu0 %v394_v25 }
  0xc6   : > { %1081 = vmatprep.subr.mxu0 %v1368_v0 }
  0xc7   : > { %v331_v26 = vpop.permute.xlu1 %330  ;;  %v329_v27 = vpop.permute.xlu0 %328 }
  0xc8   : > { %v393_v29 = vsel %vm392_vm1, %v329_v27, %v331_v26 }
  0xc9   : > { %1082 = vmatpush3.msra.mxu0 %v393_v29 }
  0xca   : > { %1145 = vmatprep.subr.mxu0 %v1368_v0  ;;  %1084 = vmatmul.mubr.f32.vlgmr.msra.gmra.mxu0 %v275_v28 }
  0xcb   : > { %v673_v30 = vpop.permute.xlu1 %672  ;;  %v671_v31 = vpop.permute.xlu0 %670  ;;  %1086 = vmatprep.mubr.msk.f32.mxu0 %vm1370_vm0, %v1368_v0 }
  0xcc   : > { %v690_v32 = vsel %vm674_vm2, %v671_v31, %v673_v30 }
  0xcd   : > { %1146 = vmatpush3.msra.mxu0 %v690_v32  ;;  %1208 = vmatpush3.msra.mxu1 %v690_v32 }
  0xce   : > { %1147 = vmatprep.subr.mxu0 %v1368_v0  ;;  %1193 = vmatprep.subr.mxu1 %v1368_v0 }
  0xcf   : > { %v669_v34 = vpop.permute.xlu1 %668  ;;  %v667_v35 = vpop.permute.xlu0 %666  ;;  %1087 = vmatmul.mubr.f32.gmra.mxu0 %v276_v33 }
  0xd0   : > { %v689_v36 = vsel %vm674_vm2, %v667_v35, %v669_v34  ;;  %1089 = vmatprep.mubr.msk.f32.mxu0 %vm1370_vm0, %v1368_v0 }
  0xd1   : > { %1148 = vmatpush3.msra.mxu0 %v689_v36  ;;  %1209 = vmatpush3.msra.mxu1 %v689_v36 }
  0xd2   : > { %1149 = vmatprep.subr.mxu0 %v1368_v0  ;;  %1194 = vmatprep.subr.mxu1 %v1368_v0 }
  0xd3   : > { %v665_v38 = vpop.permute.xlu1 %664  ;;  %v663_v39 = vpop.permute.xlu0 %662  ;;  %1090 = vmatmul.mubr.f32.gmra.mxu0 %v277_v37 }
  0xd4   : > { %v688_v40 = vsel %vm674_vm2, %v663_v39, %v665_v38  ;;  %1092 = vmatprep.mubr.msk.f32.mxu0 %vm1370_vm0, %v1368_v0 }
  0xd5   : > { %1150 = vmatpush3.msra.mxu0 %v688_v40  ;;  %1210 = vmatpush3.msra.mxu1 %v688_v40 }
  0xd6   : > { %1151 = vmatprep.subr.mxu0 %v1368_v0  ;;  %1195 = vmatprep.subr.mxu1 %v1368_v0 }
  0xd7   : > { %v661_v42 = vpop.permute.xlu1 %660  ;;  %v659_v43 = vpop.permute.xlu0 %658  ;;  %1093 = vmatmul.mubr.f32.gmra.mxu0 %v278_v41 }
  0xd8   : > { %v687_v44 = vsel %vm674_vm2, %v659_v43, %v661_v42  ;;  %1095 = vmatprep.mubr.msk.f32.mxu0 %vm1370_vm0, %v1368_v0 }
  0xd9   : > { %1152 = vmatpush3.msra.mxu0 %v687_v44  ;;  %1211 = vmatpush3.msra.mxu1 %v687_v44 }
  0xda   : > { %1153 = vmatprep.subr.mxu0 %v1368_v0  ;;  %1196 = vmatprep.subr.mxu1 %v1368_v0 }
  0xdb   : > { %v657_v46 = vpop.permute.xlu1 %656  ;;  %v655_v47 = vpop.permute.xlu0 %654  ;;  %1096 = vmatmul.mubr.f32.gmra.mxu0 %v279_v45 }
  0xdc   : > { %v686_v48 = vsel %vm674_vm2, %v655_v47, %v657_v46  ;;  %1177 = vmatprep.mubr.msk.f32.mxu0 %vm1370_vm0, %v1368_v0 }
  0xdd   : > { %1154 = vmatpush3.msra.mxu0 %v686_v48  ;;  %1212 = vmatpush3.msra.mxu1 %v686_v48 }
  0xde   : > { %1155 = vmatprep.subr.mxu0 %v1368_v0  ;;  %1197 = vmatprep.subr.mxu1 %v1368_v0 }
  0xdf   : > { %v653_v49 = vpop.permute.xlu1 %652  ;;  %v651_v50 = vpop.permute.xlu0 %650 }
  0xe0   : > { %v685_v51 = vsel %vm674_vm2, %v651_v50, %v653_v49 }
  0xe1   : > { %1156 = vmatpush3.msra.mxu0 %v685_v51  ;;  %1213 = vmatpush3.msra.mxu1 %v685_v51 }
  0xe2   : > { %1157 = vmatprep.subr.mxu0 %v1368_v0  ;;  %1198 = vmatprep.subr.mxu1 %v1368_v0 }
  0xe3   : > { %v649_v52 = vpop.permute.xlu1 %648  ;;  %v647_v53 = vpop.permute.xlu0 %646 }
  0xe4   : > { %v684_v54 = vsel %vm674_vm2, %v647_v53, %v649_v52 }
  0xe5   : > { %1158 = vmatpush3.msra.mxu0 %v684_v54  ;;  %1214 = vmatpush3.msra.mxu1 %v684_v54 }
  0xe6   : > { %1159 = vmatprep.subr.mxu0 %v1368_v0  ;;  %1199 = vmatprep.subr.mxu1 %v1368_v0 }
  0xe7   : > { %v645_v55 = vpop.permute.xlu1 %644  ;;  %v643_v56 = vpop.permute.xlu0 %642 }
  0xe8   : > { %v683_v57 = vsel %vm674_vm2, %v643_v56, %v645_v55 }
  0xe9   : > { %1160 = vmatpush3.msra.mxu0 %v683_v57  ;;  %1215 = vmatpush3.msra.mxu1 %v683_v57 }
  0xea   : > { %1161 = vmatprep.subr.mxu0 %v1368_v0  ;;  %1200 = vmatprep.subr.mxu1 %v1368_v0 }
  0xeb   : > { %v641_v58 = vpop.permute.xlu1 %640  ;;  %v639_v59 = vpop.permute.xlu0 %638 }
  0xec   : > { %v682_v60 = vsel %vm674_vm2, %v639_v59, %v641_v58 }
  0xed   : > { %1162 = vmatpush3.msra.mxu0 %v682_v60  ;;  %1216 = vmatpush3.msra.mxu1 %v682_v60 }
  0xee   : > { %1163 = vmatprep.subr.mxu0 %v1368_v0  ;;  %1201 = vmatprep.subr.mxu1 %v1368_v0 }
  0xef   : > { %v637_v61 = vpop.permute.xlu1 %636  ;;  %v635_v62 = vpop.permute.xlu0 %634 }
  0xf0   : > { %v681_v63 = vsel %vm674_vm2, %v635_v62, %v637_v61 }
  0xf1   : > { %1164 = vmatpush3.msra.mxu0 %v681_v63  ;;  %1217 = vmatpush3.msra.mxu1 %v681_v63 }
  0xf2   : > { %1165 = vmatprep.subr.mxu0 %v1368_v0  ;;  %1202 = vmatprep.subr.mxu1 %v1368_v0 }
  0xf3   : > { %v633_v1 = vpop.permute.xlu1 %632  ;;  %v631_v2 = vpop.permute.xlu0 %630 }
  0xf4   : > { %v680_v3 = vsel %vm674_vm2, %v631_v2, %v633_v1 }
  0xf5   : > { %1166 = vmatpush3.msra.mxu0 %v680_v3  ;;  %1218 = vmatpush3.msra.mxu1 %v680_v3 }
  0xf6   : > { %1167 = vmatprep.subr.mxu0 %v1368_v0  ;;  %1203 = vmatprep.subr.mxu1 %v1368_v0 }
  0xf7   : > { %v629_v4 = vpop.permute.xlu1 %628  ;;  %v627_v5 = vpop.permute.xlu0 %626 }
  0xf8   : > { %v679_v6 = vsel %vm674_vm2, %v627_v5, %v629_v4 }
  0xf9   : > { %1168 = vmatpush3.msra.mxu0 %v679_v6  ;;  %1219 = vmatpush3.msra.mxu1 %v679_v6 }
  0xfa   : > { %1169 = vmatprep.subr.mxu0 %v1368_v0  ;;  %1204 = vmatprep.subr.mxu1 %v1368_v0 }
  0xfb   : > { %v625_v7 = vpop.permute.xlu1 %624  ;;  %v623_v8 = vpop.permute.xlu0 %622 }
  0xfc   : > { %v678_v9 = vsel %vm674_vm2, %v623_v8, %v625_v7 }
  0xfd   : > { %1170 = vmatpush3.msra.mxu0 %v678_v9  ;;  %1220 = vmatpush3.msra.mxu1 %v678_v9 }
  0xfe   : > { %1171 = vmatprep.subr.mxu0 %v1368_v0  ;;  %1205 = vmatprep.subr.mxu1 %v1368_v0 }
  0xff   : > { %v621_v10 = vpop.permute.xlu1 %620  ;;  %v619_v11 = vpop.permute.xlu0 %618 }
 0x100   : > { %v677_v12 = vsel %vm674_vm2, %v619_v11, %v621_v10 }
 0x101   : > { %1172 = vmatpush3.msra.mxu0 %v677_v12  ;;  %1221 = vmatpush3.msra.mxu1 %v677_v12 }
 0x102   : > { %1173 = vmatprep.subr.mxu0 %v1368_v0  ;;  %1206 = vmatprep.subr.mxu1 %v1368_v0 }
 0x103   : > { %v617_v13 = vpop.permute.xlu1 %616  ;;  %v581_v23 = vpop.f32.mrf.mxu1 }
 0x104   : > { %v615_v14 = vpop.permute.xlu0 %614 }
 0x105   : > { %v676_v15 = vsel %vm674_vm2, %v615_v14, %v617_v13  ;;  %v1132_v25 = vpop.f32.mrf.mxu1 }
 0x106   : > { %1174 = vmatpush3.msra.mxu0 %v676_v15  ;;  %1222 = vmatpush3.msra.mxu1 %v676_v15 }
 0x107   : > { %v613_v16 = vpop.permute.xlu1 %612  ;;  %1175 = vmatprep.subr.mxu0 %v1368_v0  ;;  %1207 = vmatprep.subr.mxu1 %v1368_v0  ;;  %v586_v26 = vpop.f32.mrf.mxu1 }
 0x108   : > { %v611_v17 = vpop.permute.xlu0 %610 }
 0x109   : > { %v675_v20 = vsel %vm674_vm2, %v611_v17, %v613_v16  ;;  %v1135_v27 = vpop.f32.mrf.mxu1 }
 0x10a   : > { %1176 = vmatpush3.msra.mxu0 %v675_v20  ;;  %1223 = vmatpush3.msra.mxu1 %v675_v20 }
 0x10b   : > { %1178 = vmatmul.mubr.f32.vlgmr.msra.gmra.mxu0 %v605_v18  ;;  %1187 = vmatmul.mubr.f32.vlgmr.msra.gmra.mxu1 %v608_v19  ;;  %v591_v28 = vpop.f32.mrf.mxu1 }
 0x10c   : > { %1180 = vmatprep.mubr.msk.f32.mxu0 %vm1370_vm0, %v1368_v0  ;;  %1189 = vmatprep.mubr.msk.f32.mxu1 %vm1370_vm0, %v1368_v0 }
 0x10d   : > { %v1138_v29 = vpop.f32.mrf.mxu1 }
 0x10f   : > { %1181 = vmatmul.mubr.f32.gmra.mxu0 %v606_v21  ;;  %1190 = vmatmul.mubr.f32.gmra.mxu1 %v609_v22  ;;  %v596_v30 = vpop.f32.mrf.mxu1 }
 0x110   : > { %1183 = vmatprep.mubr.msk.f32.mxu0 %vm1370_vm0, %v1368_v0 }
 0x111   : > { %v1141_v31 = vpop.f32.mrf.mxu1 }
 0x113   : > { %1184 = vmatmul.mubr.f32.gmra.mxu0 %v607_v24  ;;  %v601_v32 = vpop.f32.mrf.mxu1 }
 0x114   : > { %v815_v43 = vpop.permute.xlu1 %814 }
 0x115   : > { %v1144_v33 = vpop.f32.mrf.mxu1  ;;  %v810_v44 = vpop.permute.xlu0 %809 }
 0x118   : > { %v820_v47 = vpop.permute.xlu1 %819 }
 0x119   : > { %v825_v48 = vpop.permute.xlu0 %824 }
 0x11c   : > { %v830_v61 = vpop.permute.xlu1 %829 }
 0x18a   : > { %v491_v34 = vpop.f32.mrf.mxu0 }
 0x18b   : > { %v582_v45 = vadd.f32 %v581_v23, %v491_v34 }
 0x18c   : > { %v1085_v35 = vpop.f32.mrf.mxu0 }
 0x18f   : > { %v496_v36 = vpop.f32.mrf.mxu0 }
 0x190   : > { %v587_v55 = vadd.f32 %v586_v26, %v496_v36 }
 0x191   : > { %v1088_v0 = vpop.f32.mrf.mxu0 }
 0x193   : > { %v501_v37 = vpop.f32.mrf.mxu0 }
 0x194   : > { %v592_v3 = vadd.f32 %v591_v28, %v501_v37 }
 0x195   : > { %v1091_v38 = vpop.f32.mrf.mxu0 }
 0x197   : > { %v506_v39 = vpop.f32.mrf.mxu0 }
 0x198   : > { %v597_v46 = vadd.f32 %v596_v30, %v506_v39 }
 0x199   : > { %v1094_v40 = vpop.f32.mrf.mxu0 }
 0x19b   : > { %v511_v41 = vpop.f32.mrf.mxu0 }
 0x19c   : > { %v602_v56 = vadd.f32 %v601_v32, %v511_v41 }
 0x19d   : > { %v1097_v42 = vpop.f32.mrf.mxu0 }
 0x1cb   : > { %v773_v49 = vpop.f32.mrf.mxu0  ;;  %v788_v50 = vpop.f32.mrf.mxu1 }
 0x1cc   : > { %v797_v51 = vadd.f32 %v773_v49, %v582_v45  ;;  %v800_v52 = vadd.f32 %v788_v50, %v597_v46 }
 0x1cd   : > { %v1179_v53 = vpop.f32.mrf.mxu0  ;;  %v1188_v54 = vpop.f32.mrf.mxu1 }
 0x1ce   : > { %v832_v57 = vadd.f32 %v810_v44, %v797_v51  ;;  %v835_v58 = vadd.f32 %v825_v48, %v800_v52 }
 0x1cf   : > { %v778_v59 = vpop.f32.mrf.mxu0  ;;  %v793_v60 = vpop.f32.mrf.mxu1 }
 0x1d0   : > { %837 = vst [vmem:[%s230_s21] sm:$0xff] %v832_v57  ;;  %840 = vst [vmem:[%s230_s21 + $0x18] sm:$0xff] %v835_v58  ;;  %v798_v62 = vadd.f32 %v778_v59, %v587_v55  ;;  %v801_v63 = vadd.f32 %v793_v60, %v602_v56 }
 0x1d1   : > { %v1182_v1 = vpop.f32.mrf.mxu0  ;;  %v1191_v2 = vpop.f32.mrf.mxu1 }
 0x1d2   : > { %v833_v4 = vadd.f32 %v815_v43, %v798_v62  ;;  %v836_v5 = vadd.f32 %v830_v61, %v801_v63 }
 0x1d3   : > { %v783_v6 = vpop.f32.mrf.mxu0 }
 0x1d4   : > { %838 = vst [vmem:[%s230_s21 + $0x8] sm:$0xff] %v833_v4  ;;  %841 = vst [vmem:[%s230_s21 + $0x20] sm:$0xff] %v836_v5  ;;  %v799_v7 = vadd.f32 %v783_v6, %v592_v3 }
 0x1d5   : > { %v1185_v8 = vpop.f32.mrf.mxu0 }
 0x1d6   : > { %v834_v9 = vadd.f32 %v820_v47, %v799_v7 }
 0x1d8   : > { %839 = vst [vmem:[%s230_s21 + $0x10] sm:$0xff] %v834_v9 }
 0x1d9   : > { %1303 = shalt.err (!%p1300_p5)
}
 0x1da   : > { %s1304_s7 = scalar_lea.hbm %s1861_s29, 640  ;;  %s1308_s10 = scalar_lea.hbm %s1913_s3, 1280 }
 0x1db   : > { %p1305_p6 = scmp.ne.s32.totalorder %s1861_s29, %s1304_s7  ;;  %p1309_p10 = scmp.lt.s32.totalorder %s1861_s29, %s1913_s3 }
 0x1dc   : > { %p1310_p11 = scmp.lt.s32.totalorder %s1308_s10, %s1304_s7 }
 0x1dd   : > { %p1306_p7 = pnand %p1305_p6, %p1436_p4 }
 0x1de   : > { %p1311_p12 = por %p1310_p11, %p1309_p10 }
 0x1df   : > { %p1307_p9 = pneg %p1306_p7 }
 0x1e1   : > { %p1312_p13 = pnand %p1311_p12, %p1307_p9 }
 0x1e3   : > { %1315 = shalt.err (!%p1312_p13)
}
 0x1e4   : > { %s1374_s19 = smov 128   ;;  %s1375_s21 = smov 8  }
 0x1e5   : > { %1226 = dma.vmem_to_hbm [thread:$0]  (%p1436_p4), %s1856_s26, 640, %s1861_s29, %s1865_s15, %s1374_s19, %s1374_s19, %s1375_s21  }
 0x1e6 PF: > { %p1232_p0 = scmp.ge.s32.totalorder %s1366_s17, 2  ;;  %s874_s23 = sand.u32 1, %s1346_s12  }
 0x1e7   : > { %s875_s27 = scalar_lea.sflag [#allocation3], %s874_s23 }
 0x1e8   : > { %p1229_p1 = pnand %p1232_p0, %p1443_p8 }
 0x1ea   : > { %p1230_p2 = pneg %p1229_p1 }
 0x1ec   : > { %1341 = dma.done.wait (%p1230_p2), %s875_s27, 640  }
 0x1ed   : > { %1343 = vsyncadd (%p1230_p2), %s875_s27, 4294966656  ;;  %s16_s17 = sadd.s32 1, %s1366_s17   ;;  %s1916_s12 = smov %s1350_s13 }
 0x1ee   : > { %p13_p3 = scmp.ge.s32.totalorder %s16_s17, 4   ;;  %s1917_s13 = smov %s1354_s14 }
 0x1ef   : > { %s1918_s14 = smov %s1449_s25  ;;  %s1919_s15 = smov %s1362_s16 }
 0x1f0   : > { %s1920_s16 = smov %s1922_s20  ;;  %15 = sbr.rel (!%p13_p3) target bundleno = 4 (0x4), region = 73 }
 0x1f5   :  { %880 = vsyncpa [#allocation3], 1 }
 0x1f6   :  { %882 = vsyncpa [#allocation3 + $0x1], 1 }

</bundles_post_ra>
